<compile_context>
chip_gen: v6e
topology: v6e:2x2x1
jax: 0.10.0
libtpu: 0.0.40
codegen_flags: <defaults>
</compile_context>

<pallas_src>
import jax
import jax.numpy as jnp
from jax.experimental import pallas as pl
from jax.experimental.pallas import tpu as pltpu


# ----------------------------- kernels (resident weights) --------------------


def _linear_kernel(x_ref, w_ref, b_ref, o_ref):
    x = x_ref[...].astype(w_ref.dtype)                 # bf16 cast in-register
    out = jnp.dot(x, w_ref[...], preferred_element_type=jnp.float32) + b_ref[...]
    o_ref[...] = out.astype(o_ref.dtype)


def _mlp_kernel(x_ref, w1_ref, b1_ref, w2_ref, b2_ref, o_ref):
    x = x_ref[...].astype(w1_ref.dtype)
    h = jnp.dot(x, w1_ref[...], preferred_element_type=jnp.float32) + b1_ref[...]
    h = jnp.maximum(h, 0.0).astype(w2_ref.dtype)       # ReLU; Dropout = identity (eval)
    out = jnp.dot(h, w2_ref[...], preferred_element_type=jnp.float32) + b2_ref[...]
    o_ref[...] = out.astype(o_ref.dtype)


def _residual_kernel(x_ref, w1_ref, b1_ref, w2_ref, b2_ref, wr_ref, br_ref, o_ref):
    x = x_ref[...].astype(w1_ref.dtype)
    h = jnp.dot(x, w1_ref[...], preferred_element_type=jnp.float32) + b1_ref[...]
    h = jnp.maximum(h, 0.0).astype(w2_ref.dtype)       # ReLU; Dropout = identity (eval)
    out = jnp.dot(h, w2_ref[...], preferred_element_type=jnp.float32) + b2_ref[...]
    out = out + jnp.dot(x, wr_ref[...], preferred_element_type=jnp.float32) + br_ref[...]
    o_ref[...] = out.astype(o_ref.dtype)


# ------------------- kernels (K-tiled reduction over hidden) -----------------


def _mlp_kernel_ktiled(x_ref, w1_ref, b1_ref, w2_ref, b2_ref, o_ref, acc_h):
    k = pl.program_id(1)

    @pl.when(k == 0)
    def _():
        acc_h[...] = jnp.zeros_like(acc_h)

    x = x_ref[...].astype(w1_ref.dtype)
    acc_h[...] += jnp.dot(x, w1_ref[...], preferred_element_type=jnp.float32)

    @pl.when(k == pl.num_programs(1) - 1)
    def _():
        h = jnp.maximum(acc_h[...] + b1_ref[...], 0.0).astype(w2_ref.dtype)
        out = jnp.dot(h, w2_ref[...], preferred_element_type=jnp.float32) + b2_ref[...]
        o_ref[...] = out.astype(o_ref.dtype)


def _residual_kernel_ktiled(x_ref, w1_ref, b1_ref, w2_ref, b2_ref,
                            wr_ref, br_ref, o_ref, acc_h, acc_r):
    k = pl.program_id(1)

    @pl.when(k == 0)
    def _():
        acc_h[...] = jnp.zeros_like(acc_h)
        acc_r[...] = jnp.zeros_like(acc_r)

    x = x_ref[...].astype(w1_ref.dtype)
    acc_h[...] += jnp.dot(x, w1_ref[...], preferred_element_type=jnp.float32)
    acc_r[...] += jnp.dot(x, wr_ref[...], preferred_element_type=jnp.float32)

    @pl.when(k == pl.num_programs(1) - 1)
    def _():
        h = jnp.maximum(acc_h[...] + b1_ref[...], 0.0).astype(w2_ref.dtype)
        out = jnp.dot(h, w2_ref[...], preferred_element_type=jnp.float32) + b2_ref[...]
        o_ref[...] = (out + acc_r[...] + br_ref[...]).astype(o_ref.dtype)


# ----------------------------- hardware / capability queries -----------------


_VMEM_CAPACITY = None
_NUM_TC = None
_BUFFERED1_OK = None


def _vmem_capacity_bytes():
    global _VMEM_CAPACITY
    if _VMEM_CAPACITY is None:
        cap = None
        try:
            cap = int(getattr(pltpu.get_tpu_info(), "vmem_capacity_bytes", 0)) or None
        except Exception:
            cap = None
        _VMEM_CAPACITY = cap if cap else (64 << 20)   # conservative fallback (v7x/TC)
    return _VMEM_CAPACITY


def _vmem_budget_bytes():
    # ~85% of physical VMEM: headroom for Mosaic internal scratch.
    return int(_vmem_capacity_bytes() * 0.85)


def _num_tensorcores():
    global _NUM_TC
    if _NUM_TC is None:
        n = 1
        try:
            kind = str(jax.devices()[0].device_kind).lower()
            if "v7" in kind:                          # 2 TensorCores per chip
                n = 2
        except Exception:
            n = 1
        _NUM_TC = n
    return _NUM_TC


def _buffered1_supported():
    """One-time probe: can constant-index weight blocks be single-buffered?"""
    global _BUFFERED1_OK
    if _BUFFERED1_OK is None:
        try:
            def probe(x_ref, w_ref, o_ref):
                o_ref[...] = x_ref[...] + w_ref[...]

            x = jnp.arange(16 * 256, dtype=jnp.float32).reshape(16, 256)
            w = jnp.ones((8, 128), jnp.float32)
            out = pl.pallas_call(
                probe,
                out_shape=jax.ShapeDtypeStruct((16, 256), jnp.float32),
                grid=(2, 2),
                in_specs=[
                    pl.BlockSpec((8, 128), lambda i, j: (i, j)),
                    pl.BlockSpec((8, 128), lambda i, j: (0, 0),
                                 pipeline_mode=pl.Buffered(1)),
                ],
                out_specs=pl.BlockSpec((8, 128), lambda i, j: (i, j)),
            )(x, w)
            _BUFFERED1_OK = bool(jnp.allclose(jax.block_until_ready(out), x + 1.0))
        except Exception:
            _BUFFERED1_OK = False
    return _BUFFERED1_OK


# ----------------------------- sizing helpers --------------------------------


def _round_up(x, m):
    return ((x + m - 1) // m) * m


def _param_bytes(params):
    return sum(int(p.size) * p.dtype.itemsize for p in params)


def _resident_need_bytes(tile_m, H, h_mid, o_pad, weight_bytes, wbuf):
    x_tile = tile_m * H * 4 * 2          # f32 activation rows, double-buffered
    x_bf16 = tile_m * H * 2              # in-kernel bf16 copy of x
    h_f32 = tile_m * h_mid * 4           # pre-ReLU intermediate
    h_bf16 = tile_m * h_mid * 2          # post-ReLU bf16 recast
    o_f32 = tile_m * o_pad * 4           # f32 result before output cast
    o_tile = tile_m * o_pad * 4 * 2      # output slab, double-buffered
    return x_tile + x_bf16 + h_f32 + h_bf16 + o_f32 + o_tile + wbuf * weight_bytes


def _ktiled_need_bytes(tile_m, tile_k, h_mid, o_pad, resident_w_bytes,
                       ktile_w_bytes, wbuf, residual):
    x_tile = tile_m * tile_k * 4 * 2     # f32 x K-chunk, double-buffered
    x_bf16 = tile_m * tile_k * 2
    acc_h = tile_m * h_mid * 4           # f32 accumulator scratch
    acc_r = tile_m * o_pad * 4 if residual else 0
    h_bf16 = tile_m * h_mid * 2
    o_f32 = tile_m * o_pad * 4
    o_tile = tile_m * o_pad * 4 * 2
    return (x_tile + x_bf16 + acc_h + acc_r + h_bf16 + o_f32 + o_tile
            + 2 * ktile_w_bytes + wbuf * resident_w_bytes)


def _pick_tile_m(M, need_fn, budget, max_tile=512, num_tc=1):
    """Row-tile size (second-to-last block dim)."""
    if M <= max_tile:
        if num_tc >= 2 and M >= 512 and M % 16 == 0:
            return M // 2  # two aligned tiles so both v7x TensorCores get work
        return M           # single full-extent block (always layout-legal)
    tile = max_tile
    while tile > 128 and need_fn(tile) > budget:
        tile //= 2
    return tile


def _vmem_limit_bytes(need, budget):
    return int(min(budget, max(int(need * 1.5), 32 << 20)))


# ----------------------------- parameters -------------------------------------


def _linear_params(key, fan_in, fan_out, pad_out=None):
    """PyTorch-like uniform init; weight stored [in, out] in bf16, bias f32."""
    kw, kb = jax.random.split(key)
    bound = 1.0 / (fan_in ** 0.5)
    w = jax.random.uniform(kw, (fan_in, fan_out), jnp.float32, -bound, bound)
    b = jax.random.uniform(kb, (1, fan_out), jnp.float32, -bound, bound)
    if pad_out is not None and pad_out > fan_out:
        w = jnp.pad(w, ((0, 0), (0, pad_out - fan_out)))
        b = jnp.pad(b, ((0, 0), (0, pad_out - fan_out)))
    return w.astype(jnp.bfloat16), b


# ----------------------------- module ------------------------------------------


class RewardHeadPallas:
    """JAX/Pallas equivalent of the PyTorch RewardHead (eval-mode forward)."""

    def __init__(self, hidden_size, num_objectives=1, head_type="linear",
                 dropout=0.1, key=None, force_k_tiling=False):
        if key is None:
            key = jax.random.PRNGKey(0)
        self.hidden_size = hidden_size
        self.num_objectives = num_objectives
        self.head_type = head_type
        self.force_k_tiling = force_k_tiling
        self.o_pad = _round_up(num_objectives, 128)   # lane-dense output width

        H, O = hidden_size, num_objectives
        if head_type == "linear":
            self.params = _linear_params(key, H, O, pad_out=self.o_pad)
            self._kernel = _linear_kernel
            self._h_mid = 0
        elif head_type == "mlp":
            k0, k1 = jax.random.split(key, 2)
            w1, b1 = _linear_params(k0, H, H // 2)
            w2, b2 = _linear_params(k1, H // 2, O, pad_out=self.o_pad)
            self.params = (w1, b1, w2, b2)
            self._kernel = _mlp_kernel
            self._h_mid = H // 2
        elif head_type == "residual":
            k0, k1, k2 = jax.random.split(key, 3)
            w1, b1 = _linear_params(k0, H, H)
            w2, b2 = _linear_params(k1, H, O, pad_out=self.o_pad)
            wr, br = _linear_params(k2, H, O, pad_out=self.o_pad)
            self.params = (w1, b1, w2, b2, wr, br)
            self._kernel = _residual_kernel
            self._h_mid = H
        else:
            raise ValueError(f"Unknown head_type: {head_type}")

        # One-time (module-cached) hardware / capability queries, resolved here
        # so no probing or host syncs happen inside the jitted forward.
        self._vmem_budget = _vmem_budget_bytes()
        self._num_tc = _num_tensorcores()
        self._use_buffered1 = _buffered1_supported()
        self._forward = jax.jit(self._forward_impl)

    # --- spec helpers ---------------------------------------------------------

    def _const_spec(self, shape):
        ndim = len(shape)
        idx = lambda *_: (0,) * ndim
        if self._use_buffered1:
            # Constant index_map -> fetched once; single-buffer to halve
            # resident weight VMEM.
            return pl.BlockSpec(shape, idx, pipeline_mode=pl.Buffered(1))
        return pl.BlockSpec(shape, idx)

    # --- pallas_call wrappers -------------------------------------------------

    def _resident_call(self, x2d, params, tile_m, vmem_limit, out_dtype):
        M, H = x2d.shape
        grid = (pl.cdiv(M, tile_m),)
        in_specs = [pl.BlockSpec((tile_m, H), lambda i: (i, 0))]
        in_specs += [self._const_spec(p.shape) for p in params]
        out_spec = pl.BlockSpec((tile_m, self.o_pad), lambda i: (i, 0))
        return pl.pallas_call(
            self._kernel,
            out_shape=jax.ShapeDtypeStruct((M, self.o_pad), out_dtype),
            grid_spec=pltpu.PrefetchScalarGridSpec(
                num_scalar_prefetch=0, grid=grid,
                in_specs=in_specs, out_specs=out_spec),
            compiler_params=pltpu.CompilerParams(
                dimension_semantics=("parallel",),
                vmem_limit_bytes=vmem_limit),
        )(x2d, *params)

    def _ktiled_call(self, x2d, params, tile_m, tile_k, vmem_limit, out_dtype):
        M, H = x2d.shape
        h_mid, o_pad = self._h_mid, self.o_pad
        residual = self.head_type == "residual"
        grid = (pl.cdiv(M, tile_m), H // tile_k)
        cs = self._const_spec

        x_spec = pl.BlockSpec((tile_m, tile_k), lambda i, k: (i, k))
        if residual:
            w1, b1, w2, b2, wr, br = params
            in_specs = [x_spec,
                        pl.BlockSpec((tile_k, h_mid), lambda i, k: (k, 0)),
                        cs(b1.shape), cs(w2.shape), cs(b2.shape),
                        pl.BlockSpec((tile_k, o_pad), lambda i, k: (k, 0)),
                        cs(br.shape)]
            kernel = _residual_kernel_ktiled
            scratch = [pltpu.VMEM((tile_m, h_mid), jnp.float32),
                       pltpu.VMEM((tile_m, o_pad), jnp.float32)]
        else:
            w1, b1, w2, b2 = params
            in_specs = [x_spec,
                        pl.BlockSpec((tile_k, h_mid), lambda i, k: (k, 0)),
                        cs(b1.shape), cs(w2.shape), cs(b2.shape)]
            kernel = _mlp_kernel_ktiled
            scratch = [pltpu.VMEM((tile_m, h_mid), jnp.float32)]

        out_spec = pl.BlockSpec((tile_m, o_pad), lambda i, k: (i, 0))
        return pl.pallas_call(
            kernel,
            out_shape=jax.ShapeDtypeStruct((M, o_pad), out_dtype),
            grid_spec=pltpu.PrefetchScalarGridSpec(
                num_scalar_prefetch=0, grid=grid,
                in_specs=in_specs, out_specs=out_spec,
                scratch_shapes=scratch),
            compiler_params=pltpu.CompilerParams(
                dimension_semantics=("parallel", "arbitrary"),
                vmem_limit_bytes=vmem_limit),
        )(x2d, *params)

    # --- forward ---------------------------------------------------------------

    def _forward_impl(self, hidden_states, *params):
        lead = hidden_states.shape[:-1]
        H = self.hidden_size
        out_dtype = hidden_states.dtype
        x2d = hidden_states.reshape(-1, H)           # no bf16 pre-pass; cast in-kernel
        M = x2d.shape[0]

        budget = self._vmem_budget
        num_tc = self._num_tc
        h_mid, o_pad = self._h_mid, self.o_pad
        wbuf = 1 if self._use_buffered1 else 2
        wbytes = _param_bytes(params)

        # Decide whether the first-layer matmul needs a reduction (K) grid axis.
        use_ktiled = False
        tile_k = None
        if self.head_type in ("mlp", "residual"):
            tile_k = next((c for c in (512, 256, 128) if H % c == 0 and c < H), None)
            if tile_k is not None and (self.force_k_tiling
                                       or wbuf * wbytes > 0.45 * budget):
                use_ktiled = True

        if not use_ktiled:
            need = lambda tm: _resident_need_bytes(tm, H, h_mid, o_pad, wbytes, wbuf)
            max_tile = 2048 if self.head_type == "linear" else 512
            tile_m = _pick_tile_m(M, need, budget, max_tile, num_tc)
            vmem_limit = _vmem_limit_bytes(need(tile_m), budget)
            out2d = self._resident_call(x2d, params, tile_m, vmem_limit, out_dtype)
        else:
            residual = self.head_type == "residual"
            w1_bytes = H * h_mid * 2
            wr_bytes = H * o_pad * 2 if residual else 0
            res_w = max(wbytes - w1_bytes - wr_bytes, 0)
            k_w = tile_k * h_mid * 2 + (tile_k * o_pad * 2 if residual else 0)
            need = lambda tm: _ktiled_need_bytes(tm, tile_k, h_mid, o_pad,
                                                 res_w, k_w, wbuf, residual)
            tile_m = _pick_tile_m(M, need, budget, 512, num_tc)
            vmem_limit = _vmem_limit_bytes(need(tile_m), budget)
            out2d = self._ktiled_call(x2d, params, tile_m, tile_k,
                                      vmem_limit, out_dtype)

        # Slice + reshape stay under the same jit -> fused with the kernel output.
        out2d = out2d[:, : self.num_objectives]
        return out2d.reshape(*lead, self.num_objectives)

    def __call__(self, hidden_states):
        return self._forward(hidden_states, *self.params)

    # pure-JAX reference (emulating the kernel's bf16 operand rounding)
    def reference(self, hidden_states):
        f32 = jnp.float32
        x = hidden_states.astype(jnp.bfloat16).astype(f32)
        O = self.num_objectives
        if self.head_type == "linear":
            w, b = self.params
            out = x @ w.astype(f32) + b
        elif self.head_type == "mlp":
            w1, b1, w2, b2 = self.params
            h = jnp.maximum(x @ w1.astype(f32) + b1, 0.0)
            h = h.astype(jnp.bfloat16).astype(f32)
            out = h @ w2.astype(f32) + b2
        else:  # residual
            w1, b1, w2, b2, wr, br = self.params
            h = jnp.maximum(x @ w1.astype(f32) + b1, 0.0)
            h = h.astype(jnp.bfloat16).astype(f32)
            out = (h @ w2.astype(f32) + b2) + (x @ wr.astype(f32) + br)
        return out[..., :O].astype(hidden_states.dtype)


# ----------------------------- main -------------------------------------------


if __name__ == "__main__":
    key = jax.random.PRNGKey(0)
    k_in, k_p = jax.random.split(key)

    batch, seq, hidden = 2, 8, 32
    num_objectives = 1
    hidden_states = jax.random.normal(k_in, (batch, seq, hidden), jnp.float32)

    ok = True

    # Resident-weight path (all head types).
    for head_type in ("linear", "mlp", "residual"):
        head = RewardHeadPallas(hidden, num_objectives=num_objectives,
                                head_type=head_type, key=k_p)
        out = jax.block_until_ready(head(hidden_states))
        ref = head.reference(hidden_states)
        assert out.shape == (batch, seq, num_objectives), out.shape
        if not jnp.allclose(out, ref, atol=2e-3, rtol=2e-3):
            ok = False

    # K-tiled (reduction-over-hidden) path, exercised at a small shape
    # (hidden=256 -> tile_k=128, two accumulation steps).
    hidden_k = 256
    hs_k = jax.random.normal(k_in, (batch, seq, hidden_k), jnp.float32)
    for head_type in ("mlp", "residual"):
        head = RewardHeadPallas(hidden_k, num_objectives=num_objectives,
                                head_type=head_type, key=k_p,
                                force_k_tiling=True)
        out = jax.block_until_ready(head(hs_k))
        ref = head.reference(hs_k)
        assert out.shape == (batch, seq, num_objectives), out.shape
        if not jnp.allclose(out, ref, atol=2e-3, rtol=2e-3):
            ok = False

    if ok:
        print("KERNEL_OK")
</pallas_src>

<mosaic_0001>
module attributes {stable_mosaic.version = 11 : i64} {
  func.func @probe(%arg0: i32, %arg1: i32, %arg2: memref<8x128xf32, #tpu.memory_space<vmem>>, %arg3: memref<8x128xf32, #tpu.memory_space<vmem>>, %arg4: memref<8x128xf32, #tpu.memory_space<vmem>>) attributes {dimension_semantics = [#tpu.dimension_semantics<arbitrary>, #tpu.dimension_semantics<arbitrary>], iteration_bounds = array<i64: 2, 2>, scalar_prefetch = 0 : i64, scratch_operands = 0 : i64, tpu.core_type = #tpu.core_type<tc>, window_params = [{transform_indices = @transform_0, window_bounds = array<i64: 8, 128>}, {pipeline_mode = #tpu.pipeline_mode<synchronous>, transform_indices = @transform_1, window_bounds = array<i64: 8, 128>}, {transform_indices = @transform_2, window_bounds = array<i64: 8, 128>}]} {
    %c0 = arith.constant 0 : index
    %c0_0 = arith.constant 0 : index
    %0 = vector.load %arg2[%c0, %c0_0] : memref<8x128xf32, #tpu.memory_space<vmem>>, vector<8x128xf32>
    %c0_1 = arith.constant 0 : index
    %c0_2 = arith.constant 0 : index
    %1 = vector.load %arg3[%c0_1, %c0_2] : memref<8x128xf32, #tpu.memory_space<vmem>>, vector<8x128xf32>
    %2 = arith.addf %0, %1 : vector<8x128xf32>
    %c0_3 = arith.constant 0 : index
    %c0_4 = arith.constant 0 : index
    %3 = vector.load %arg4[%c0_3, %c0_4] : memref<8x128xf32, #tpu.memory_space<vmem>>, vector<8x128xf32>
    tpu.vector_store %arg4[%c0_3, %c0_4], %2 {strides = array<i32>} : memref<8x128xf32, #tpu.memory_space<vmem>>, vector<8x128xf32>,
    return
  }
  func.func @transform_0(%arg0: i32, %arg1: i32) -> (i32, i32) {
    %c0_i32 = arith.constant 0 : i32
    return %arg0, %arg1 : i32, i32
  }
  func.func @transform_1(%arg0: i32, %arg1: i32) -> (i32, i32) {
    %c0_i32 = arith.constant 0 : i32
    %c0_i32_0 = arith.constant 0 : i32
    %c0_i32_1 = arith.constant 0 : i32
    return %c0_i32, %c0_i32_0 : i32, i32
  }
  func.func @transform_2(%arg0: i32, %arg1: i32) -> (i32, i32) {
    %c0_i32 = arith.constant 0 : i32
    return %arg0, %arg1 : i32, i32
  }
}

module attributes {stable_mosaic.version = 11 : i64} {
  func.func @_linear_kernel(%arg0: i32, %arg1: memref<16x32xf32, #tpu.memory_space<vmem>>, %arg2: memref<32x128xbf16, #tpu.memory_space<vmem>>, %arg3: memref<1x128xf32, #tpu.memory_space<vmem>>, %arg4: memref<16x128xf32, #tpu.memory_space<vmem>>) attributes {dimension_semantics = [#tpu.dimension_semantics<parallel>], iteration_bounds = array<i64: 1>, scalar_prefetch = 0 : i64, scratch_operands = 0 : i64, tpu.core_type = #tpu.core_type<tc>, window_params = [{transform_indices = @transform_0, window_bounds = array<i64: 16, 32>}, {pipeline_mode = #tpu.pipeline_mode<synchronous>, transform_indices = @transform_1, window_bounds = array<i64: 32, 128>}, {pipeline_mode = #tpu.pipeline_mode<synchronous>, transform_indices = @transform_2, window_bounds = array<i64: 1, 128>}, {transform_indices = @transform_3, window_bounds = array<i64: 16, 128>}]} {
    %c0 = arith.constant 0 : index
    %c0_0 = arith.constant 0 : index
    %0 = vector.load %arg1[%c0, %c0_0] : memref<16x32xf32, #tpu.memory_space<vmem>>, vector<16x32xf32>
    %1 = arith.truncf %0 : vector<16x32xf32> to vector<16x32xbf16>
    %c0_1 = arith.constant 0 : index
    %c0_2 = arith.constant 0 : index
    %2 = vector.load %arg2[%c0_1, %c0_2] : memref<32x128xbf16, #tpu.memory_space<vmem>>, vector<32x128xbf16>
    %cst = arith.constant dense<0.000000e+00> : vector<16x128xf32>
    %3 = tpu.matmul %1, %2, %cst {dimension_numbers = #tpu.dot_dimension_numbers<[1], [0], [0], [1], [0, 0, 1, 1], [], []>} : vector<16x32xbf16>, vector<32x128xbf16>, vector<16x128xf32> -> vector<16x128xf32>
    %c0_3 = arith.constant 0 : index
    %c0_4 = arith.constant 0 : index
    %4 = vector.load %arg3[%c0_3, %c0_4] : memref<1x128xf32, #tpu.memory_space<vmem>>, vector<1x128xf32>
    %5 = vector.broadcast %4 : vector<1x128xf32> to vector<16x128xf32>
    %6 = arith.addf %3, %5 : vector<16x128xf32>
    %c0_5 = arith.constant 0 : index
    %c0_6 = arith.constant 0 : index
    %7 = vector.load %arg4[%c0_5, %c0_6] : memref<16x128xf32, #tpu.memory_space<vmem>>, vector<16x128xf32>
    tpu.vector_store %arg4[%c0_5, %c0_6], %6 {strides = array<i32>} : memref<16x128xf32, #tpu.memory_space<vmem>>, vector<16x128xf32>,
    return
  }
  func.func @transform_0(%arg0: i32) -> (i32, i32) {
    %c0_i32 = arith.constant 0 : i32
    %c0_i32_0 = arith.constant 0 : i32
    return %arg0, %c0_i32 : i32, i32
  }
  func.func @transform_1(%arg0: i32) -> (i32, i32) {
    %c0_i32 = arith.constant 0 : i32
    %c0_i32_0 = arith.constant 0 : i32
    %c0_i32_1 = arith.constant 0 : i32
    return %c0_i32, %c0_i32_0 : i32, i32
  }
  func.func @transform_2(%arg0: i32) -> (i32, i32) {
    %c0_i32 = arith.constant 0 : i32
    %c0_i32_0 = arith.constant 0 : i32
    %c0_i32_1 = arith.constant 0 : i32
    return %c0_i32, %c0_i32_0 : i32, i32
  }
  func.func @transform_3(%arg0: i32) -> (i32, i32) {
    %c0_i32 = arith.constant 0 : i32
    %c0_i32_0 = arith.constant 0 : i32
    return %arg0, %c0_i32 : i32, i32
  }
}

</mosaic_0001>

<bundles_post_ra>
// kernel: tpu_custom_call.1
= control target key start
LH: loop header
LB: loop body
LE: loop exit
PB: predicated region body
PF: predicated region fallthrough
CT: control target
= control target key end

     0   :  { %s768_s0 = inlined_call_operand.hbm [shape: f32[16,256], index: 0, kind: input, shape index: {}]   ;;  %s769_s1 = inlined_call_operand.hbm [shape: f32[8,128], index: 1, kind: input, shape index: {}]   ;;  %s770_s2 = inlined_call_operand.hbm [shape: f32[16,256], index: 2, kind: output, shape index: {}]  }
   0x1   :  { %775 = sst [smem:[#allocation14_spill]] %s769_s1 }
   0x2   :  { %7 = vsyncpa [#allocation3], 0 }
   0x3   :  { %9 = vsyncpa [#allocation3 + $0x1], 0 }
   0x4   :  { %10 = vsyncpa [#allocation6], 0 }
   0x5   :  { %11 = vsyncpa [#allocation4], 0 }
   0x6   :  { %13 = vsyncpa [#allocation4 + $0x1], 0  ;;  %s585_s9 = smov 0   ;;  %s587_s10 = smov 0  }
   0x7   :  { %s589_s11 = smov 0   ;;  %s591_s12 = smov 0  }
   0x8   :  { %s593_s13 = smov 0   ;;  %s595_s14 = smov 0  }
   0x9   :  { %s597_s15 = smov 0   ;;  %s599_s16 = smov 0  }
   0xa LB: > { %776 = sst [smem:[#allocation11_spill]] %s537_s9  ;;  %s305_s17 = sadd.s32 4294967295, %s565_s16   ;;  %s565_s16 = sphi %s599_s16, %s19_s16   ;;  %s561_s15 = sphi %s597_s15, %s799_s15   ;;  %s557_s14 = sphi %s595_s14, %s798_s14   ;;  %s553_s13 = sphi %s593_s13, %s797_s13   ;;  %s549_s12 = sphi %s591_s12, %s796_s12   ;;  %s545_s11 = sphi %s589_s11, %s795_s11   ;;  %s541_s10 = sphi %s587_s10, %s794_s10   ;;  %s537_s9 = sphi %s585_s9, %s793_s9  }
   0xb   : > { %s306_s18 = sadd.s32 4294967294, %s565_s16   ;;  %p53_p0 = scmp.ne.s32.totalorder %s541_s10, %s537_s9 }
   0xc   : > { %p629_p1 = scmp.eq.s32.totalorder %s305_s17, 0  ;;  %p633_p2 = scmp.eq.s32.totalorder %s305_s17, 3 }
   0xd   : > { %p106_p3 = scmp.eq.s32.totalorder %s306_s18, 3  ;;  %p307_p5 = scmp.ge.s32.totalorder %s565_s16, 1 }
   0xe   : > { %p639_p4 = por %p629_p1, %p53_p0  ;;  %p113_p7 = scmp.lt.s32.totalorder %s565_s16, 5 }
   0xf   : > { %p644_p6 = por %p106_p3, %p53_p0  ;;  %s567_s24 = smov [#allocation5]  }
  0x10   : > { %p649_p8 = pnand %p307_p5, %p113_p7  ;;  %s126_s25 = sshll.u32 %s567_s24, 4  ;;  %s127_s25 = int_to_ptr.vmem [resolvable:$true] %s126_s25 }
  0x11   : > { %s780_s22 = scalar_select %p644_p6, 1, 0 }
  0x12   : > { %p330_p9 = pneg %p649_p8  ;;  %s28_s26 = sadd.s32 1, %s557_s14 }
  0x13   : > { %781 = sst [smem:[#allocation12_spill]] %s780_s22  ;;  %s422_s27 = scalar_lea.vmem %s127_s25, 128 }
  0x14   : > { %p331_p10 = pnand %p330_p9, %p629_p1  ;;  %p423_p12 = scmp.ne.s32.totalorder %s127_s25, %s422_s27 }
  0x15   : > { %p430_p3 = scmp.lt.s32.totalorder %s127_s25, %s127_s25  ;;  %p431_p6 = scmp.lt.s32.totalorder %s422_s27, %s422_s27 }
  0x16   : > { %p413_p11 = pneg %p331_p10 }
  0x17   : > { %p432_p5 = por %p431_p6, %p430_p3 }
  0x18   : > { %p425_p13 = pnand %p423_p12, %p413_p11 }
  0x1a   : > { %p426_p0 = pneg %p425_p13 }
  0x1c   : > { %p433_p7 = pnand %p432_p5, %p426_p0 }
  0x1e   : > { %436 = shalt.err (!%p433_p7)
}
  0x1f   : > { %s783_s1 = sld [smem:[#allocation14_spill]]  ;;  %p29_p9 = scmp.ge.s32.totalorder %s28_s26, 2 }
  0x20   : > { %s31_s30 = sadd.s32 1, %s561_s15  ;;  %s40_s3 = sadd.s32 1, %s545_s11 }
  0x21   : > { %p47_p6 = scmp.ne.s32.totalorder %s545_s11, %s541_s10  ;;  %s801_s26 = smov (%p29_p9, %s28_s26), 0 }
  0x22   : > { %784 = sst [smem:[#allocation13_spill]] %s801_s26  ;;  %s803_s30 = smov (!%p29_p9, %s31_s30), %s561_s15 }
  0x23   : > { %s36_s4 = ssub.s32 %s557_s14, %s801_s26  ;;  %p48_p11 = scmp.eq.s32.totalorder %s565_s16, 0 }
  0x24   : > { %p33_p12 = scmp.ge.s32.totalorder %s803_s30, 2  ;;  %p673_p13 = por %p633_p2, %p47_p6 }
  0x25   : > { %333 = dma.hbm_to_vmem [thread:$0]  (!%p331_p10), %s783_s1, 128, %s127_s25, [#allocation6]  }
  0x26   : > { %s785_s5 = scalar_select %p673_p13, 1, 0 }
  0x27   : > { %p677_p10 = por %p48_p11, %p47_p6  ;;  %p343_p0 = scmp.lt.s32.totalorder %s565_s16, 4 }
  0x28   : > { %s805_s30 = smov (%p33_p12, %s803_s30), 0  ;;  %s137_s7 = sand.u32 1, %s545_s11  }
  0x29   : > { %s311_s8 = sshll.u32 %s561_s15, 1  ;;  %s35_s17 = ssub.s32 %s561_s15, %s805_s30 }
  0x2a   : > { %s37_s18 = sor.u32 %s36_s4, %s35_s17  ;;  %s310_s24 = sshll.u32 %s137_s7, 3 }
  0x2b   : > { %p38_p3 = scmp.eq.s32.totalorder %s37_s18, 0  ;;  %s146_s20 = sadd.s32 %s557_s14, %s311_s8 }
  0x2c   : > { %s141_s25 = scalar_lea.vmem [#allocation2], %s310_s24  ;;  %s312_s29 = sshll.u32 %s146_s20, 7 }
  0x2d   : > { %s150_s27 = sshll.u32 %s141_s25, 4  ;;  %s148_s22 = scalar_lea.hbm %s768_s0, %s312_s29  ;;  %s151_s27 = int_to_ptr.vmem [resolvable:$true] %s150_s27 }
  0x2e   : > { %s690_s28 = scalar_select %p38_p3, %s545_s11, %s40_s3  }
  0x2f   : > { %p699_p2 = pnand %p343_p0, %p677_p10  ;;  %s138_s4 = scalar_lea.sflag [#allocation3], %s137_s7 }
  0x30   : > { %s450_s8 = scalar_lea.vmem %s151_s27, 128  ;;  %s568_s3 = smov [#allocation2]  }
  0x31   : > { %p439_p5 = pneg %p699_p2  ;;  %p451_p7 = scmp.ne.s32.totalorder %s151_s27, %s450_s8 }
  0x32   : > { %s455_s17 = sshll.u32 %s568_s3, 4  ;;  %s456_s17 = int_to_ptr.vmem [resolvable:$false] %s455_s17 }
  0x33   : > { %p453_p9 = pnand %p451_p7, %p439_p5  ;;  %s457_s18 = scalar_lea.vmem %s456_s17, 256 }
  0x34   : > { %p458_p11 = scmp.lt.s32.totalorder %s151_s27, %s456_s17  ;;  %p459_p12 = scmp.lt.s32.totalorder %s457_s18, %s450_s8 }
  0x35   : > { %p454_p6 = pneg %p453_p9 }
  0x36   : > { %p460_p3 = por %p459_p12, %p458_p11 }
  0x38   : > { %p461_p13 = pnand %p460_p3, %p454_p6 }
  0x3a   : > { %464 = shalt.err (!%p461_p13)
}
  0x3b   : > { %337 = dma.hbm_to_vmem [thread:$0]  (!%p699_p2), %s148_s22, 128, %s151_s27, %s138_s4  }
  0x3c   : > { %159 = sbr.rel (%p649_p8) target bundleno = 94 (0x5e), region = 28  ;;  %s710_s1 = sand.u32 (!%p649_p8), 1, %s541_s10  }
  0x3d   : > { %s314_s26 = sshll.u32 (!%p649_p8), %s710_s1, 3  ;;  %s162_s6 = scalar_lea.sflag (!%p649_p8), [#allocation3], %s710_s1 }
  0x3e   : > { %s165_s7 = scalar_lea.vmem (!%p649_p8), [#allocation2], %s314_s26 }
  0x41   : > { %524 = dma.done.wait (%p639_p4), %s162_s6, 128  }
  0x42   : > { %526 = vsyncadd (%p639_p4), %s162_s6, 4294967168 }
  0x43   : > { %528 = dma.done.wait (%p629_p1), [#allocation6], 128  }
  0x44   : > { %530 = vsyncadd (%p629_p1), [#allocation6], 4294967168  ;;  %s318_s9 = sshll.u32 %s553_s13, 1  ;;  %s189_s23 = scalar_lea.vmem [#allocation7], %s314_s26  ;;  %v190_v0 = vld [vmem:[%s165_s7] sm:$0xff]  ;;  %v191_v1 = vld [vmem:[#allocation5] sm:$0xff] }
  0x45   : > { %s206_s22 = sadd.s32 %s549_s12, %s318_s9  ;;  %s210_s24 = sshll.u32 %s189_s23, 4  ;;  %v192_v2 = vadd.f32 %v191_v1, %v190_v0  ;;  %s211_s24 = int_to_ptr.vmem [resolvable:$true] %s210_s24 }
  0x46   : > { %s319_s20 = sshll.u32 %s206_s22, 7  ;;  %s195_s19 = scalar_lea.sflag [#allocation4], %s710_s1 }
  0x47   : > { %s208_s27 = scalar_lea.hbm %s770_s2, %s319_s20  ;;  %193 = vst [vmem:[%s189_s23] sm:$0xff] %v192_v2  ;;  %s465_s29 = scalar_lea.vmem %s211_s24, 128 }
  0x48   : > { %p466_p1 = scmp.ne.s32.totalorder %s211_s24, %s465_s29  ;;  %p788_p4 = scmp.ne.s32.totalorder %s785_s5, 0 }
  0x49   : > { %s569_s13 = smov [#allocation7]  }
  0x4a   : > { %p467_p8 = pnand %p466_p1, %p788_p4  ;;  %s469_s12 = sshll.u32 %s569_s13, 4  ;;  %s470_s12 = int_to_ptr.vmem [resolvable:$false] %s469_s12 }
  0x4b   : > { %s471_s4 = scalar_lea.vmem %s470_s12, 256  ;;  %p472_p10 = scmp.lt.s32.totalorder %s211_s24, %s470_s12 }
  0x4c   : > { %p468_p13 = pneg %p467_p8  ;;  %p473_p0 = scmp.lt.s32.totalorder %s471_s4, %s465_s29 }
  0x4e   : > { %p474_p2 = por %p473_p0, %p472_p10 }
  0x50   : > { %p475_p5 = pnand %p474_p2, %p468_p13 }
  0x52   : > { %478 = shalt.err (!%p475_p5)
}
  0x53   : > { %s479_s8 = scalar_lea.hbm %s208_s27, 128  ;;  %s483_s18 = scalar_lea.hbm %s770_s2, 512 }
  0x54   : > { %p480_p7 = scmp.ne.s32.totalorder %s208_s27, %s479_s8  ;;  %p484_p11 = scmp.lt.s32.totalorder %s208_s27, %s770_s2 }
  0x55   : > { %p485_p12 = scmp.lt.s32.totalorder %s483_s18, %s479_s8 }
  0x56   : > { %p481_p9 = pnand %p480_p7, %p788_p4 }
  0x57   : > { %p486_p3 = por %p485_p12, %p484_p11 }
  0x58   : > { %p482_p6 = pneg %p481_p9 }
  0x5a   : > { %p487_p1 = pnand %p486_p3, %p482_p6 }
  0x5c   : > { %490 = shalt.err (!%p487_p1)
}
  0x5d   : > { %328 = dma.vmem_to_hbm [thread:$0]  (%p788_p4), %s211_s24, 128, %s208_s27, %s195_s19  }
  0x5e PF: > { %s789_s6 = sld [smem:[#allocation11_spill]]  ;;  %p345_p8 = scmp.ge.s32.totalorder %s565_s16, 2 }
  0x5f   : > { %s790_s7 = sld [smem:[#allocation12_spill]] }
  0x64   : > { %s222_s9 = sand.u32 1, %s789_s6  }
  0x65   : > { %p791_p13 = scmp.ne.s32.totalorder %s790_s7, 0  ;;  %s223_s22 = scalar_lea.sflag [#allocation4], %s222_s9 }
  0x67   : > { %p339_p10 = pnand %p345_p8, %p791_p13 }
  0x69   : > { %p340_p0 = pneg %p339_p10 }
  0x6b   : > { %532 = dma.done.wait (%p340_p0), %s223_s22, 128  }
  0x6c   : > { %534 = vsyncadd (%p340_p0), %s223_s22, 4294967168  ;;  %s19_s16 = sadd.s32 1, %s565_s16   ;;  %s792_s5 = sld [smem:[#allocation13_spill]] }
  0x6d   : > { %p16_p2 = scmp.ge.s32.totalorder %s19_s16, 6   ;;  %s793_s9 = smov %s541_s10 }
  0x6e   : > { %s794_s10 = smov %s545_s11  ;;  %s795_s11 = smov %s690_s28 }
  0x6f   : > { %s796_s12 = smov %s557_s14  ;;  %s797_s13 = smov %s561_s15 }
  0x70   : > { %s799_s15 = smov %s805_s30  ;;  %18 = sbr.rel (!%p16_p2) target bundleno = 10 (0xa), region = 77 }
  0x72   : > { %s798_s14 = smov %s792_s5 }
  0x75   :  { %228 = vsyncpa [#allocation3], 1 }
  0x76   :  { %230 = vsyncpa [#allocation3 + $0x1], 1 }
  0x77   :  { %231 = vsyncpa [#allocation6], 1 }
  0x78   :  { %232 = vsyncpa [#allocation4], 1 }
  0x79   :  { %234 = vsyncpa [#allocation4 + $0x1], 1 }

// kernel: _forward_impl.1
= control target key start
LH: loop header
LB: loop body
LE: loop exit
PB: predicated region body
PF: predicated region fallthrough
CT: control target
= control target key end

     0   :  { %8 = vsyncpa [#allocation3], 0  ;;  %s234_s0 = inlined_call_operand.hbm [shape: f32[16,32], index: 0, kind: input, shape index: {}]   ;;  %s235_s1 = inlined_call_operand.hbm [shape: bf16[32,128], index: 1, kind: input, shape index: {}]   ;;  %s236_s2 = inlined_call_operand.vmem [shape: f32[1,128], index: 2, kind: input, shape index: {}]   ;;  %s237_s3 = inlined_call_operand.vmem [shape: f32[16,128], index: 3, kind: output, shape index: {}]  }
   0x1   :  { %9 = vsyncpa [#allocation5], 0  ;;  %s191_s12 = smov [#allocation2]  }
   0x2   :  { %s15_s13 = sshll.u32 %s191_s12, 4  ;;  %s16_s13 = int_to_ptr.vmem [resolvable:$true] %s15_s13 }
   0x3   :  { %s155_s14 = scalar_lea.vmem %s16_s13, 256  ;;  %p160_p1 = scmp.lt.s32.totalorder %s16_s13, %s16_s13 }
   0x4   :  { %p156_p0 = scmp.ne.s32.totalorder %s16_s13, %s155_s14  ;;  %p161_p2 = scmp.lt.s32.totalorder %s155_s14, %s155_s14 }
   0x6   :  { %p162_p3 = por %p161_p2, %p160_p1 }
   0x8   :  { %p163_p4 = pnand %p162_p3, %p156_p0 }
   0xa   :  { %166 = shalt.err (!%p163_p4)
}
   0xb   :  { %s192_s15 = smov 128   ;;  %s193_s16 = smov 8  }
   0xc   :  { %21 = dma.hbm_to_vmem [thread:$0]  %s234_s0, 256, %s16_s13, [#allocation3], %s192_s15, %s192_s15, %s193_s16  }
   0xd   :  { %s194_s19 = smov [#allocation4]  }
   0xe   :  { %s27_s20 = sshll.u32 %s194_s19, 4  ;;  %s28_s20 = int_to_ptr.vmem [resolvable:$true] %s27_s20 }
   0xf   :  { %s175_s21 = scalar_lea.vmem %s28_s20, 256  ;;  %p180_p6 = scmp.lt.s32.totalorder %s28_s20, %s28_s20 }
  0x10   :  { %p176_p5 = scmp.ne.s32.totalorder %s28_s20, %s175_s21  ;;  %p181_p7 = scmp.lt.s32.totalorder %s175_s21, %s175_s21 }
  0x12   :  { %p182_p8 = por %p181_p7, %p180_p6 }
  0x14   :  { %p183_p9 = pnand %p182_p8, %p176_p5 }
  0x16   :  { %186 = shalt.err (!%p183_p9)
}
  0x17   :  { %s195_s22 = smov 64   ;;  %s196_s23 = smov 4  }
  0x18   :  { %33 = dma.hbm_to_vmem [thread:$0]  %s235_s1, 256, %s28_s20, [#allocation5], %s195_s22, %s195_s22, %s196_s23  }
  0x19   :  { %187 = dma.done.wait [#allocation3], 256  }
  0x1a   :  { %188 = vsyncadd [#allocation3], 4294967040 }
  0x1b   :  { %189 = dma.done.wait [#allocation5], 256  }
  0x1c   :  { %190 = vsyncadd [#allocation5], 4294967040  ;;  %v197_v0 = vmov 0.0   ;;  %vm198_vm0 = vmmov 0   ;;  %v145_v1 = vld [vmem:[#allocation4 + $0x8] sm:$0xff]   ;;  %v146_v2 = vld [vmem:[#allocation4] sm:$0xff]  }
  0x1d   :  { %129 = vmatprep.subr.bf16.mxu0 %v197_v0  ;;  %133 = vmatprep.mubr.msk.bf16.mxu0 %vm198_vm0, %v197_v0  ;;  %v43_v3 = vld [vmem:[#allocation2] sm:$0xff]  ;;  %v44_v4 = vld [vmem:[#allocation2 + $0x8] sm:$0xff]  ;;  %vm69_vm1 = vcmask 261120  }
  0x1e   :  { %130 = vmatpush3.bf16.msra.mxu0 %v145_v1  ;;  %v45_v5 = vpack.c.bf16 %v44_v4, %v43_v3  ;;  %v122_v6 = vld [vmem:[%s236_s2] ss:$0 sm:$0xff] }
  0x1f   :  { %131 = vmatprep.subr.bf16.mxu0 %v197_v0 }
  0x22   :  { %132 = vmatpush3.bf16.msra.mxu0 %v146_v2 }
  0x25   :  { %134 = vmatmul.mubr.msk.bf16.vlgmr.msra.gmra.mxu0 %vm69_vm1, %v45_v5 }
  0xe5   :  { %v107_v7 = vpop.f32.mrf.mxu0 }
  0xe6   :  { %v108_v8 = vadd.f32 %v122_v6, %v107_v7 }
  0xe7   :  { %v135_v9 = vpop.f32.mrf.mxu0 }
  0xe8   :  { %114 = vst [vmem:[%s237_s3] sm:$0xff] %v108_v8 }
  0xe9   :  { %v110_v10 = vpop.f32.mrf.mxu0 }
  0xea   :  { %v111_v11 = vadd.f32 %v122_v6, %v110_v10 }
  0xeb   :  { %v136_v12 = vpop.f32.mrf.mxu0 }
  0xec   :  { %115 = vst [vmem:[%s237_s3 + $0x8] sm:$0xff] %v111_v11 }
  0xed   :  { %120 = vsyncpa [#allocation3], 1 }
  0xee   :  { %121 = vsyncpa [#allocation5], 1 }

</bundles_post_ra>
